<compile_context>
chip_gen: v6e
topology: v6e:2x2x1
jax: 0.10.0
libtpu: 0.0.40
codegen_flags: <defaults>
</compile_context>

<pallas_src>
import math
from types import SimpleNamespace

import jax
import jax.numpy as jnp
from jax.experimental import pallas as pl

# ------------------------- model dimensions (small) -------------------------
Z_DIM = 32      # latent z
C_DIM = 25      # camera conditioning (16 pose + 9 intrinsics), as in EG3D
HIDDEN = 64     # mapping hidden width
W_DIM = 32      # style w width
NUM_WS = 4      # broadcast w count
RES = 16        # image resolution
C0 = 32         # const feature channels
C1 = 32         # conv1 output channels
HW = RES * RES  # 256 = 2 full 128-lane vregs -> lane-dense image rows


def _lrelu(x):
    return jnp.where(x > 0, x, 0.2 * x)


# --------------------------- Pallas kernels ---------------------------------
def mapping_kernel(zc_ref, w0_ref, b0_ref, w1_ref, b1_ref, out_ref):
    """EG3DGenerator.style(): 2-layer mapping MLP on [z, c] (single VMEM step)."""
    h = jnp.dot(zc_ref[...], w0_ref[...],
                preferred_element_type=jnp.float32) + b0_ref[...]
    h = _lrelu(h)
    w = jnp.dot(h, w1_ref[...],
                preferred_element_type=jnp.float32) + b1_ref[...]
    out_ref[...] = _lrelu(w)


def fused_synth_loss_kernel(w_ref, const_ref, a1w_ref, a1b_ref,
                            c1w_ref, c1wsq_ref, c1b_ref,
                            argbw_ref, argbb_ref, rgbw_ref, rgbb_ref,
                            target_ref, img_ref, loss_ref):
    """Fused: style-modulated 1x1 conv (+demod) -> toRGB -> MSE vs target.

    Channel-major (C, HW) layout keeps every matmul N-dim at HW=256 (2 full
    128-lane vregs) and makes the (3, HW) image store lane-dense.  Everything
    stays in VMEM; only the image and the (1,1) loss go back to HBM.
    """
    w = w_ref[...]                                                     # (W_DIM, 1)
    # modulation style
    s1 = jnp.dot(a1w_ref[...], w,
                 preferred_element_type=jnp.float32) + a1b_ref[...]    # (C0, 1)
    x = const_ref[...] * s1                                            # (C0, HW)
    y = jnp.dot(c1w_ref[...], x,
                preferred_element_type=jnp.float32)                    # (C1, HW)
    # demodulation (StyleGAN2): rsqrt(sum_i (w_ji * s_i)^2 + eps); w^2 is
    # precomputed at init and passed in (hoisted out of the hot path).
    demod = jax.lax.rsqrt(
        jnp.dot(c1wsq_ref[...], s1 * s1,
                preferred_element_type=jnp.float32) + 1e-8)            # (C1, 1)
    y = _lrelu(y * demod + c1b_ref[...])                               # (C1, HW)
    # toRGB (modulated, no demodulation, as in StyleGAN2/EG3D)
    srgb = jnp.dot(argbw_ref[...], w,
                   preferred_element_type=jnp.float32) + argbb_ref[...]  # (C1, 1)
    img = jnp.dot(rgbw_ref[...], y * srgb,
                  preferred_element_type=jnp.float32) + rgbb_ref[...]    # (3, HW)
    img_ref[...] = img
    # TODO(synk): jojogan_img_loss_eg3d uses LPIPS(VGG) on 256x256 area-
    #             interpolated images; MSE proxy computed in-kernel instead.
    d = img - target_ref[...]
    loss_ref[...] = jnp.sum(d * d, keepdims=True) / d.size


# --------------------------- JAX wrappers ------------------------------------
def mapping_forward(z, c, p):
    """style(z, c) -> w of shape (B, W_DIM). Single VMEM-resident call."""
    zc = jnp.concatenate([z, c], axis=-1).astype(jnp.float32)
    B = zc.shape[0]
    return pl.pallas_call(
        mapping_kernel,
        out_shape=jax.ShapeDtypeStruct((B, W_DIM), jnp.float32),
    )(zc, p["map_w0"], p["map_b0"], p["map_w1"], p["map_b1"])


_FUSED_COST = pl.CostEstimate(
    flops=int(2 * HW * (C0 * C1 + 3 * C1)          # conv1 + toRGB matmuls
              + 2 * C0 * W_DIM + 2 * C1 * (C0 + W_DIM)  # style / demod dots
              + 8 * C1 * HW),                      # elementwise
    transcendentals=int(C1),                       # rsqrt
    bytes_accessed=int(4 * (C0 * HW                # const
                            + 2 * C1 * C0 + C1 * W_DIM + C0 * W_DIM  # weights
                            + 3 * HW               # target
                            + C0 + 2 * C1 + 3 + W_DIM               # biases, w
                            + 3 * HW + 1)),        # outputs
)


def fused_synthesis_loss(w_col, target_cm, p):
    """One pallas_call: synthesis of a single image + MSE against target."""
    img, loss = pl.pallas_call(
        fused_synth_loss_kernel,
        out_shape=(jax.ShapeDtypeStruct((3, HW), jnp.float32),
                   jax.ShapeDtypeStruct((1, 1), jnp.float32)),
        cost_estimate=_FUSED_COST,
    )(w_col, p["const_cm"], p["a1_wt"], p["a1_b"],
      p["conv1_wt"], p["conv1_wt_sq"], p["conv1_b"],
      p["argb_wt"], p["argb_b"], p["convrgb_wt"], p["convrgb_b"],
      target_cm)
    return img, loss[0, 0]


def only_img_forward(params, z, c, w_get_jojo, target_img):
    """'only_img' branch: frozen mapping (dead in this branch, DCE'd under jit,
    matching the torch code where w_styles is computed but never read), then
    trainable-copy synthesis of w_get_jojo[0] fused with the image loss."""
    c_rep = jnp.tile(c, (z.shape[0], 1))
    _w_styles = jax.lax.stop_gradient(mapping_forward(z, c_rep, params))
    del _w_styles  # unused in only_img (as in the reference); XLA DCEs it.

    w_col = w_get_jojo[0, 0, :].astype(jnp.float32).reshape(W_DIM, 1)
    target_cm = target_img.astype(jnp.float32).reshape(3, HW)  # NCHW flatten, no transpose
    img_cm, loss = fused_synthesis_loss(w_col, target_cm, params)
    img = img_cm.reshape(1, 3, RES, RES)                       # free reshape to NCHW
    return img, loss


_only_img_forward_jit = jax.jit(only_img_forward)


def fov_to_intrinsics(fov_degrees):
    focal_length = float(1 / (math.tan(fov_degrees * 3.14159 / 360) * 1.414))
    return jnp.array([[focal_length, 0, 0.5],
                      [0, focal_length, 0.5],
                      [0, 0, 1]], dtype=jnp.float32)


def reference_only_img(params, w_get_jojo, target_img):
    """Plain-JAX reference of the fused kernel (HIGHEST matmul precision)."""
    hp = jax.lax.Precision.HIGHEST
    w = w_get_jojo[0, 0, :].astype(jnp.float32).reshape(W_DIM, 1)
    s1 = jnp.dot(params["a1_wt"], w, precision=hp) + params["a1_b"]
    x = params["const_cm"] * s1
    y = jnp.dot(params["conv1_wt"], x, precision=hp)
    demod = jax.lax.rsqrt(
        jnp.dot(params["conv1_wt"] ** 2, s1 * s1, precision=hp) + 1e-8)
    y = _lrelu(y * demod + params["conv1_b"])
    srgb = jnp.dot(params["argb_wt"], w, precision=hp) + params["argb_b"]
    img = jnp.dot(params["convrgb_wt"], y * srgb, precision=hp) + params["convrgb_b"]
    img = img.reshape(1, 3, RES, RES)
    loss = jnp.mean((img - target_img.astype(jnp.float32)) ** 2)
    return img, loss


# --------------------------- ZSSGAN (JAX) ------------------------------------
class ZSSGAN:
    def __init__(self, args, key):
        self.args = args
        ks = jax.random.split(key, 8)

        def init(k, shape, fan_in):
            return jax.random.normal(k, shape, jnp.float32) / math.sqrt(fan_in)

        # generator_frozen / generator_trainable / generator_trainable_copy all
        # share identical deterministic synthetic weights here.  Weights are
        # stored channel-major / transposed so the fused kernel needs no
        # in-kernel transposes.
        self.params = {
            "map_w0": init(ks[0], (Z_DIM + C_DIM, HIDDEN), Z_DIM + C_DIM),
            "map_b0": jnp.zeros((1, HIDDEN), jnp.float32),
            "map_w1": init(ks[1], (HIDDEN, W_DIM), HIDDEN),
            "map_b1": jnp.zeros((1, W_DIM), jnp.float32),
            "const_cm": init(ks[2], (C0, HW), 1),
            "a1_wt": init(ks[3], (C0, W_DIM), W_DIM),
            "a1_b": jnp.ones((C0, 1), jnp.float32),
            "conv1_wt": init(ks[4], (C1, C0), C0),
            "conv1_b": jnp.zeros((C1, 1), jnp.float32),
            "argb_wt": init(ks[5], (C1, W_DIM), W_DIM),
            "argb_b": jnp.ones((C1, 1), jnp.float32),
            "convrgb_wt": init(ks[6], (3, C1), C1),
            "convrgb_b": jnp.zeros((3, 1), jnp.float32),
        }
        # demod term hoisted out of the hot path (was squared per grid step).
        self.params["conv1_wt_sq"] = self.params["conv1_wt"] ** 2

        self.c_front = jnp.array(
            [1, 0, 0, 0, 0, -1, 0, 0, 0, 0, -1, 2.7, 0, 0, 0, 1,
             4.2647, 0, 0.5, 0, 4.2647, 0.5, 0, 0, 1],
            dtype=jnp.float32).reshape(1, -1)
        self.auto_layer_iters = args.auto_layer_iters
        self.training = True

    def style(self, z_codes, c, truncation=0.7):
        c_rep = jnp.tile(c, (z_codes[0].shape[0], 1))
        return mapping_forward(z_codes[0], c_rep, self.params)

    def forward(self, target_img, cam_pose_target, w_get_nada, w_get_jojo,
                epoch, args, styles, labels=None):
        c = labels if labels is not None else self.c_front

        if args.type == "only_img":
            # TODO(synk): determine_opt_layers / freeze-unfreeze bookkeeping is
            #             a training-time parameter-flag dance with no forward
            #             compute; skipped.
            img, finalloss = _only_img_forward_jit(
                self.params, styles[0], c, w_get_jojo, target_img)
            return ([img, img], finalloss)

        # TODO(synk): 'fusion' and 'only_text' branches require CLIP loss models
        #             and LookAtPoseSampler camera augmentation; not implemented.
        raise NotImplementedError(args.type)


# ------------------------------- main ----------------------------------------
if __name__ == "__main__":
    key = jax.random.PRNGKey(0)
    k_model, k_z, k_jojo, k_tgt = jax.random.split(key, 4)

    args = SimpleNamespace(type="only_img", auto_layer_iters=1, auto_layer_k=1,
                           phase=None, source_class="photo", target_class="sketch")

    net = ZSSGAN(args, k_model)

    B = 2
    styles = [jax.random.normal(k_z, (B, Z_DIM), jnp.float32)]
    w_get_jojo = jax.random.normal(k_jojo, (B, NUM_WS, W_DIM), jnp.float32)
    w_get_nada = w_get_jojo
    target_img = jax.random.normal(k_tgt, (1, 3, RES, RES), jnp.float32)

    intrinsics = fov_to_intrinsics(18.0)
    cam_pose_target = jnp.concatenate(
        [net.c_front[:, :16], intrinsics.reshape(1, 9)], axis=1)   # (1, 25)

    (imgs, loss) = net.forward(target_img, cam_pose_target, w_get_nada,
                               w_get_jojo, epoch=1, args=args, styles=styles)
    jax.block_until_ready(imgs[0])
    jax.block_until_ready(loss)
    assert imgs[0].shape == (1, 3, RES, RES)

    # full plain-JAX reference of the fused synthesis + loss
    img_ref, loss_ref = reference_only_img(net.params, w_get_jojo, target_img)
    assert jnp.allclose(imgs[0], img_ref, rtol=1e-3, atol=1e-3)
    assert jnp.allclose(loss, loss_ref, rtol=1e-3, atol=1e-3)
    # internal consistency: in-kernel MSE vs MSE of the emitted image
    assert jnp.allclose(loss, jnp.mean((imgs[0] - target_img) ** 2),
                        rtol=1e-5, atol=1e-5)

    # standalone mapping kernel (style) sanity check
    w_map = net.style(styles, net.c_front)
    jax.block_until_ready(w_map)
    assert w_map.shape == (B, W_DIM)
    zc = jnp.concatenate([styles[0], jnp.tile(net.c_front, (B, 1))], axis=-1)
    hp = jax.lax.Precision.HIGHEST
    h = _lrelu(jnp.dot(zc, net.params["map_w0"], precision=hp) + net.params["map_b0"])
    w_map_ref = _lrelu(jnp.dot(h, net.params["map_w1"], precision=hp) + net.params["map_b1"])
    assert jnp.allclose(w_map, w_map_ref, rtol=1e-3, atol=1e-3)

    print("KERNEL_OK")
</pallas_src>

<mosaic_0001>
module attributes {stable_mosaic.version = 11 : i64} {
  func.func @fused_synth_loss_kernel(%arg0: memref<32x1xf32, #tpu.memory_space<vmem>>, %arg1: memref<32x256xf32, #tpu.memory_space<vmem>>, %arg2: memref<32x32xf32, #tpu.memory_space<vmem>>, %arg3: memref<32x1xf32, #tpu.memory_space<vmem>>, %arg4: memref<32x32xf32, #tpu.memory_space<vmem>>, %arg5: memref<32x32xf32, #tpu.memory_space<vmem>>, %arg6: memref<32x1xf32, #tpu.memory_space<vmem>>, %arg7: memref<32x32xf32, #tpu.memory_space<vmem>>, %arg8: memref<32x1xf32, #tpu.memory_space<vmem>>, %arg9: memref<3x32xf32, #tpu.memory_space<vmem>>, %arg10: memref<3x1xf32, #tpu.memory_space<vmem>>, %arg11: memref<3x256xf32, #tpu.memory_space<vmem>>, %arg12: memref<3x256xf32, #tpu.memory_space<vmem>>, %arg13: memref<1x1xf32, #tpu.memory_space<vmem>>) attributes {dimension_semantics = [], scalar_prefetch = 0 : i64, scratch_operands = 0 : i64, tpu.core_type = #tpu.core_type<tc>} {
    %c0 = arith.constant 0 : index
    %c0_0 = arith.constant 0 : index
    %0 = vector.load %arg0[%c0, %c0_0] : memref<32x1xf32, #tpu.memory_space<vmem>>, vector<32x1xf32>
    %c0_1 = arith.constant 0 : index
    %c0_2 = arith.constant 0 : index
    %1 = vector.load %arg2[%c0_1, %c0_2] : memref<32x32xf32, #tpu.memory_space<vmem>>, vector<32x32xf32>
    %cst = arith.constant dense<0.000000e+00> : vector<32x1xf32>
    %2 = tpu.matmul %1, %0, %cst {dimension_numbers = #tpu.dot_dimension_numbers<[1], [0], [0], [1], [0, 0, 1, 1], [], []>} : vector<32x32xf32>, vector<32x1xf32>, vector<32x1xf32> -> vector<32x1xf32>
    %c0_3 = arith.constant 0 : index
    %c0_4 = arith.constant 0 : index
    %3 = vector.load %arg3[%c0_3, %c0_4] : memref<32x1xf32, #tpu.memory_space<vmem>>, vector<32x1xf32>
    %4 = arith.addf %2, %3 : vector<32x1xf32>
    %c0_5 = arith.constant 0 : index
    %c0_6 = arith.constant 0 : index
    %5 = vector.load %arg1[%c0_5, %c0_6] : memref<32x256xf32, #tpu.memory_space<vmem>>, vector<32x256xf32>
    %6 = vector.broadcast %4 : vector<32x1xf32> to vector<32x256xf32>
    %7 = arith.mulf %5, %6 : vector<32x256xf32>
    %c0_7 = arith.constant 0 : index
    %c0_8 = arith.constant 0 : index
    %8 = vector.load %arg4[%c0_7, %c0_8] : memref<32x32xf32, #tpu.memory_space<vmem>>, vector<32x32xf32>
    %cst_9 = arith.constant dense<0.000000e+00> : vector<32x256xf32>
    %9 = tpu.matmul %8, %7, %cst_9 {dimension_numbers = #tpu.dot_dimension_numbers<[1], [0], [0], [1], [0, 0, 1, 1], [], []>} : vector<32x32xf32>, vector<32x256xf32>, vector<32x256xf32> -> vector<32x256xf32>
    %c0_10 = arith.constant 0 : index
    %c0_11 = arith.constant 0 : index
    %10 = vector.load %arg5[%c0_10, %c0_11] : memref<32x32xf32, #tpu.memory_space<vmem>>, vector<32x32xf32>
    %11 = arith.mulf %4, %4 : vector<32x1xf32>
    %cst_12 = arith.constant dense<0.000000e+00> : vector<32x1xf32>
    %12 = tpu.matmul %10, %11, %cst_12 {dimension_numbers = #tpu.dot_dimension_numbers<[1], [0], [0], [1], [0, 0, 1, 1], [], []>} : vector<32x32xf32>, vector<32x1xf32>, vector<32x1xf32> -> vector<32x1xf32>
    %cst_13 = arith.constant 9.99999993E-9 : f32
    %13 = vector.broadcast %cst_13 : f32 to vector<32x1xf32>
    %14 = arith.addf %12, %13 : vector<32x1xf32>
    %15 = math.rsqrt %14 : vector<32x1xf32>
    %16 = vector.broadcast %15 : vector<32x1xf32> to vector<32x256xf32>
    %17 = arith.mulf %9, %16 : vector<32x256xf32>
    %c0_14 = arith.constant 0 : index
    %c0_15 = arith.constant 0 : index
    %18 = vector.load %arg6[%c0_14, %c0_15] : memref<32x1xf32, #tpu.memory_space<vmem>>, vector<32x1xf32>
    %19 = vector.broadcast %18 : vector<32x1xf32> to vector<32x256xf32>
    %20 = arith.addf %17, %19 : vector<32x256xf32>
    %cst_16 = arith.constant 0.000000e+00 : f32
    %21 = vector.broadcast %cst_16 : f32 to vector<32x256xf32>
    %22 = arith.cmpf ogt, %20, %21 : vector<32x256xf32>
    %cst_17 = arith.constant 2.000000e-01 : f32
    %23 = vector.broadcast %cst_17 : f32 to vector<32x256xf32>
    %24 = arith.mulf %23, %20 : vector<32x256xf32>
    %25 = arith.select %22, %20, %24 : vector<32x256xi1>, vector<32x256xf32>
    %c0_18 = arith.constant 0 : index
    %c0_19 = arith.constant 0 : index
    %26 = vector.load %arg7[%c0_18, %c0_19] : memref<32x32xf32, #tpu.memory_space<vmem>>, vector<32x32xf32>
    %cst_20 = arith.constant dense<0.000000e+00> : vector<32x1xf32>
    %27 = tpu.matmul %26, %0, %cst_20 {dimension_numbers = #tpu.dot_dimension_numbers<[1], [0], [0], [1], [0, 0, 1, 1], [], []>} : vector<32x32xf32>, vector<32x1xf32>, vector<32x1xf32> -> vector<32x1xf32>
    %c0_21 = arith.constant 0 : index
    %c0_22 = arith.constant 0 : index
    %28 = vector.load %arg8[%c0_21, %c0_22] : memref<32x1xf32, #tpu.memory_space<vmem>>, vector<32x1xf32>
    %29 = arith.addf %27, %28 : vector<32x1xf32>
    %c0_23 = arith.constant 0 : index
    %c0_24 = arith.constant 0 : index
    %30 = vector.load %arg9[%c0_23, %c0_24] : memref<3x32xf32, #tpu.memory_space<vmem>>, vector<3x32xf32>
    %31 = vector.broadcast %29 : vector<32x1xf32> to vector<32x256xf32>
    %32 = arith.mulf %25, %31 : vector<32x256xf32>
    %cst_25 = arith.constant dense<0.000000e+00> : vector<3x256xf32>
    %33 = tpu.matmul %30, %32, %cst_25 {dimension_numbers = #tpu.dot_dimension_numbers<[1], [0], [0], [1], [0, 0, 1, 1], [], []>} : vector<3x32xf32>, vector<32x256xf32>, vector<3x256xf32> -> vector<3x256xf32>
    %c0_26 = arith.constant 0 : index
    %c0_27 = arith.constant 0 : index
    %34 = vector.load %arg10[%c0_26, %c0_27] : memref<3x1xf32, #tpu.memory_space<vmem>>, vector<3x1xf32>
    %35 = vector.broadcast %34 : vector<3x1xf32> to vector<3x256xf32>
    %36 = arith.addf %33, %35 : vector<3x256xf32>
    %c0_28 = arith.constant 0 : index
    %c0_29 = arith.constant 0 : index
    %37 = vector.load %arg12[%c0_28, %c0_29] : memref<3x256xf32, #tpu.memory_space<vmem>>, vector<3x256xf32>
    tpu.vector_store %arg12[%c0_28, %c0_29], %36 {strides = array<i32>} : memref<3x256xf32, #tpu.memory_space<vmem>>, vector<3x256xf32>,
    %c0_30 = arith.constant 0 : index
    %c0_31 = arith.constant 0 : index
    %38 = vector.load %arg11[%c0_30, %c0_31] : memref<3x256xf32, #tpu.memory_space<vmem>>, vector<3x256xf32>
    %39 = arith.subf %36, %38 : vector<3x256xf32>
    %40 = arith.mulf %39, %39 : vector<3x256xf32>
    %41 = vector.shape_cast %40 : vector<3x256xf32> to vector<1x3x256xf32>
    %cst_32 = arith.constant dense<0.000000e+00> : vector<1xf32>
    %42 = vector.multi_reduction <add>, %41, %cst_32 [1, 2] : vector<1x3x256xf32> to vector<1xf32>
    %43 = vector.shape_cast %42 : vector<1xf32> to vector<1x1x1xf32>
    %44 = vector.extract %43[0, 0, 0] : f32 from vector<1x1x1xf32>
    %45 = vector.broadcast %44 : f32 to vector<1x1xf32>
    %cst_33 = arith.constant 7.680000e+02 : f32
    %46 = vector.broadcast %cst_33 : f32 to vector<1x1xf32>
    %47 = arith.divf %45, %46 : vector<1x1xf32>
    %c0_34 = arith.constant 0 : index
    %c0_35 = arith.constant 0 : index
    %48 = vector.load %arg13[%c0_34, %c0_35] : memref<1x1xf32, #tpu.memory_space<vmem>>, vector<1x1xf32>
    tpu.vector_store %arg13[%c0_34, %c0_35], %47 {strides = array<i32>} : memref<1x1xf32, #tpu.memory_space<vmem>>, vector<1x1xf32>,
    return
  }
}

</mosaic_0001>

<bundles_post_ra>
// kernel: only_img_forward.1
= control target key start
LH: loop header
LB: loop body
LE: loop exit
PB: predicated region body
PF: predicated region fallthrough
CT: control target
= control target key end

     0   :  { %vm56_vm0 = vcmask 261120   ;;  %s1121_s0 = inlined_call_operand.vmem [shape: f32[32,1], index: 0, kind: input, shape index: {}]   ;;  %s1122_s1 = inlined_call_operand.vmem [shape: f32[32,256], index: 1, kind: input, shape index: {}]   ;;  %s1123_s2 = inlined_call_operand.vmem [shape: f32[32,32], index: 2, kind: input, shape index: {}]   ;;  %s1124_s3 = inlined_call_operand.vmem [shape: f32[32,1], index: 3, kind: input, shape index: {}]   ;;  %s1125_s4 = inlined_call_operand.vmem [shape: f32[32,32], index: 4, kind: input, shape index: {}]   ;;  %s1126_s5 = inlined_call_operand.vmem [shape: f32[32,32], index: 5, kind: input, shape index: {}]   ;;  %s1127_s6 = inlined_call_operand.vmem [shape: f32[32,1], index: 6, kind: input, shape index: {}]   ;;  %s1128_s7 = inlined_call_operand.vmem [shape: f32[32,32], index: 7, kind: input, shape index: {}]   ;;  %s1129_s8 = inlined_call_operand.vmem [shape: f32[32,1], index: 8, kind: input, shape index: {}]   ;;  %s1130_s9 = inlined_call_operand.vmem [shape: f32[3,32], index: 9, kind: input, shape index: {}]   ;;  %s1131_s10 = inlined_call_operand.vmem [shape: f32[3,1], index: 10, kind: input, shape index: {}]   ;;  %s1132_s11 = inlined_call_operand.vmem [shape: f32[3,256], index: 11, kind: input, shape index: {}]   ;;  %s1133_s12 = inlined_call_operand.vmem [shape: f32[3,256], index: 12, kind: output, shape index: {0}]   ;;  %s1134_s13 = inlined_call_operand.hbm [shape: f32[1,1], index: 13, kind: output, shape index: {1}]  }
   0x1   :  { %v948_v0 = vld [vmem:[%s1121_s0 + $0x18] sm:$0xff]  ;;  %v953_v1 = vld [vmem:[%s1121_s0 + $0x10] sm:$0xff]  ;;  %v48_v2 = vld [vmem:[%s1123_s2] sm:$0xff] }
   0x2   :  { %792 = vmatprep.subr.mxu0 %v948_v0  ;;  %v963_v3 = vld [vmem:[%s1121_s0 + $0x8] sm:$0xff]  ;;  %800 = vmatprep.mubr.msk.f32.mxu0 %vm56_vm0, %v48_v2 }
   0x3   :  { %793 = vmatpush3.msra.mxu0 %v948_v0 }
   0x4   :  { %794 = vmatprep.subr.mxu0 %v953_v1 }
   0x5   :  { %19 = vsyncpa [#allocation3], 0  ;;  %795 = vmatpush3.msra.mxu0 %v953_v1  ;;  %v971_v4 = vld [vmem:[%s1121_s0] sm:$0xff]  ;;  %v49_v5 = vld [vmem:[%s1123_s2 + $0x8] sm:$0xff]  ;;  %v872_v8 = vmov 0   ;;  %v873_v30 = vmov 0.0  }
   0x6   :  { %796 = vmatprep.subr.mxu0 %v963_v3  ;;  %v50_v6 = vld [vmem:[%s1123_s2 + $0x10] sm:$0xff]  ;;  %v51_v7 = vld [vmem:[%s1123_s2 + $0x18] sm:$0xff]  ;;  %840 = vset.pattern.permute.xlu1 %v872_v8  ;;  %v295_v9 = vld [vmem:[%s1126_s5] sm:$0xff]  ;;  %vm715_vm9 = vcmask 1042432   ;;  %vm731_vm10 = vcmask 0  }
   0x7   :  { %797 = vmatpush3.msra.mxu0 %v963_v3  ;;  %839 = vset.pattern.permute.xlu0 %v872_v8  ;;  %v53_v10 = vld [vmem:[%s1124_s3 + $0x8] sm:$0xff]  ;;  %v52_v14 = vld [vmem:[%s1124_s3] sm:$0xff]  ;;  %v55_v15 = vld [vmem:[%s1124_s3 + $0x18] sm:$0xff] }
   0x8   :  { %798 = vmatprep.subr.mxu0 %v971_v4  ;;  %v54_v17 = vld [vmem:[%s1124_s3 + $0x10] sm:$0xff]  ;;  %v435_v25 = vld [vmem:[%s1127_s6 + $0x18] sm:$0xff]  ;;  %v296_v27 = vld [vmem:[%s1126_s5 + $0x8] sm:$0xff]  ;;  %270 = vmatprep.mubr.f32.mxu1 %v873_v30 }
   0x9   :  { %799 = vmatpush3.msra.mxu0 %v971_v4  ;;  %v297_v28 = vld [vmem:[%s1126_s5 + $0x10] sm:$0xff]  ;;  %v298_v31 = vld [vmem:[%s1126_s5 + $0x18] sm:$0xff]  ;;  %v488_v32 = vld [vmem:[%s1128_s7] sm:$0xff] }
   0xa   :  { %801 = vmatmul.mubr.msk.f32.vlgmr.msra.gmra.mxu0 %vm56_vm0, %v49_v5  ;;  %v434_v29 = vld [vmem:[%s1127_s6 + $0x10] sm:$0xff]  ;;  %v489_v33 = vld [vmem:[%s1128_s7 + $0x8] sm:$0xff]  ;;  %v491_v35 = vld [vmem:[%s1128_s7 + $0x18] sm:$0xff] }
   0xb   :  { %803 = vmatprep.mubr.msk.f32.mxu0 %vm56_vm0, %v50_v6  ;;  %v490_v34 = vld [vmem:[%s1128_s7 + $0x10] sm:$0xff]  ;;  %v161_v36 = vld [vmem:[%s1122_s1 + $0x38] sm:$0xff]  ;;  %v158_v42 = vld [vmem:[%s1122_s1 + $0x20] sm:$0xff] }
   0xc   :  { %v160_v37 = vld [vmem:[%s1122_s1 + $0x30] sm:$0xff]  ;;  %v159_v43 = vld [vmem:[%s1122_s1 + $0x28] sm:$0xff]  ;;  %v157_v44 = vld [vmem:[%s1122_s1 + $0x18] sm:$0xff] }
   0xd   :  { %v156_v46 = vld [vmem:[%s1122_s1 + $0x10] sm:$0xff]  ;;  %v155_v49 = vld [vmem:[%s1122_s1 + $0x8] sm:$0xff]  ;;  %v154_v52 = vld [vmem:[%s1122_s1] sm:$0xff] }
   0xe   :  { %804 = vmatmul.mubr.msk.f32.gmra.mxu0 %vm56_vm0, %v51_v7  ;;  %v190_v56 = vld [vmem:[%s1125_s4] sm:$0xff]  ;;  %v191_v57 = vld [vmem:[%s1125_s4 + $0x8] sm:$0xff]  ;;  %v192_v58 = vld [vmem:[%s1125_s4 + $0x10] sm:$0xff] }
   0xf   :  { %814 = vmatprep.mubr.msk.f32.mxu0 %vm56_vm0, %v295_v9  ;;  %v193_v59 = vld [vmem:[%s1125_s4 + $0x18] sm:$0xff] }
  0x10   :  { %v495_v9 = vld [vmem:[%s1129_s8 + $0x18] sm:$0xff] }
  0xca   :  { %v802_v11 = vpop.f32.mrf.mxu0 }
  0xcb   :  { %v141_v12 = vadd.f32 %v802_v11, %v53_v10  ;;  %v433_v10 = vld [vmem:[%s1127_s6 + $0x8] sm:$0xff] }
  0xcc   :  { %v135_v13 = vpop.f32.mrf.mxu0 }
  0xcd   :  { %169 = vperm.xlu1 %840, %v141_v12   ;;  %v136_v18 = vadd.f32 %v135_v13, %v52_v14  ;;  %v300_v24 = vmul.f32 %v141_v12, %v141_v12  ;;  %v432_v14 = vld [vmem:[%s1127_s6] sm:$0xff] }
  0xce   :  { %v805_v16 = vpop.f32.mrf.mxu0 }
  0xcf   :  { %v151_v19 = vadd.f32 %v805_v16, %v55_v15  ;;  %v299_v26 = vmul.f32 %v136_v18, %v136_v18  ;;  %v493_v15 = vld [vmem:[%s1129_s8 + $0x8] sm:$0xff] }
  0xd0   :  { %v145_v20 = vpop.f32.mrf.mxu0 }
  0xd1   :  { %v302_v21 = vmul.f32 %v151_v19, %v151_v19  ;;  %v146_v22 = vadd.f32 %v145_v20, %v54_v17  ;;  %179 = vperm.xlu0 %839, %v151_v19   ;;  %164 = vperm.xlu1 %840, %v136_v18   ;;  %v494_v17 = vld [vmem:[%s1129_s8 + $0x10] sm:$0xff]  ;;  %v492_v20 = vld [vmem:[%s1129_s8] sm:$0xff] }
  0xd3   :  { %v301_v23 = vmul.f32 %v146_v22, %v146_v22  ;;  %806 = vmatprep.subr.mxu0 %v302_v21 }
  0xd4   :  { %807 = vmatpush3.msra.mxu0 %v302_v21  ;;  %v622_v21 = vld [vmem:[%s1131_s10] sm:$0x7] }
  0xd5   :  { %174 = vperm.xlu0 %839, %v146_v22   ;;  %808 = vmatprep.subr.mxu0 %v301_v23 }
  0xd6   :  { %809 = vmatpush3.msra.mxu0 %v301_v23 }
  0xd7   :  { %810 = vmatprep.subr.mxu0 %v300_v24 }
  0xd8   :  { %811 = vmatpush3.msra.mxu0 %v300_v24 }
  0xd9   :  { %453 = vperm.xlu0 %839, %v435_v25   ;;  %812 = vmatprep.subr.mxu0 %v299_v26 }
  0xda   :  { %813 = vmatpush3.msra.mxu0 %v299_v26 }
  0xdb   :  { %815 = vmatmul.mubr.msk.f32.vlgmr.msra.gmra.mxu0 %vm56_vm0, %v296_v27  ;;  %820 = vmatprep.subr.mxu0 %v948_v0 }
  0xdc   :  { %817 = vmatprep.mubr.msk.f32.mxu0 %vm56_vm0, %v297_v28  ;;  %821 = vmatpush3.msra.mxu0 %v948_v0 }
  0xdd   :  { %448 = vperm.xlu0 %839, %v434_v29   ;;  %822 = vmatprep.subr.mxu0 %v953_v1 }
  0xde   :  { %823 = vmatpush3.msra.mxu0 %v953_v1 }
  0xdf   :  { %818 = vmatmul.mubr.msk.f32.gmra.mxu0 %vm56_vm0, %v298_v31  ;;  %824 = vmatprep.subr.mxu0 %v963_v3 }
  0xe0   :  { %825 = vmatpush3.msra.mxu0 %v963_v3  ;;  %828 = vmatprep.mubr.msk.f32.mxu0 %vm56_vm0, %v488_v32 }
  0xe1   :  { %826 = vmatprep.subr.mxu0 %v971_v4 }
  0xe2   :  { %827 = vmatpush3.msra.mxu0 %v971_v4 }
  0xe3   :  { %829 = vmatmul.mubr.msk.f32.vlgmr.msra.gmra.mxu0 %vm56_vm0, %v489_v33 }
  0xe4   :  { %831 = vmatprep.mubr.msk.f32.mxu0 %vm56_vm0, %v490_v34 }
  0xe7   :  { %832 = vmatmul.mubr.msk.f32.gmra.mxu0 %vm56_vm0, %v491_v35 }
 0x148   :  { %v170_v38 = vpop.permute.xlu1 %169 }
 0x149   :  { %v185_v51 = vmul.f32 %v170_v38, %v157_v44  ;;  %v184_v53 = vmul.f32 %v170_v38, %v156_v46 }
 0x14c   :  { %v180_v39 = vpop.permute.xlu0 %179  ;;  %v165_v50 = vpop.permute.xlu1 %164 }
 0x14d   :  { %v189_v40 = vmul.f32 %v180_v39, %v161_v36  ;;  %v188_v41 = vmul.f32 %v180_v39, %v160_v37  ;;  %v183_v54 = vmul.f32 %v165_v50, %v155_v49  ;;  %v182_v55 = vmul.f32 %v165_v50, %v154_v52 }
 0x14f   :  { %230 = vmatprep.subr.mxu1 %v189_v40 }
 0x150   :  { %231 = vmatpush1.msra.mxu1 %v188_v41  ;;  %v175_v45 = vpop.permute.xlu0 %174 }
 0x151   :  { %v186_v47 = vmul.f32 %v175_v45, %v158_v42  ;;  %v187_v48 = vmul.f32 %v175_v45, %v159_v43 }
 0x153   :  { %232 = vmatprep.subr.mxu1 %v187_v48 }
 0x154   :  { %233 = vmatpush1.msra.mxu1 %v186_v47  ;;  %v454_v27 = vpop.permute.xlu0 %453 }
 0x155   :  { %234 = vmatprep.subr.mxu1 %v185_v51 }
 0x156   :  { %235 = vmatpush1.msra.mxu1 %v184_v53 }
 0x157   :  { %236 = vmatprep.subr.mxu1 %v183_v54 }
 0x158   :  { %237 = vmatpush1.msra.mxu1 %v182_v55  ;;  %v449_v31 = vpop.permute.xlu0 %448 }
 0x159   :  { %755 = vmatmul.mubr.msk.f32.vlgmr.msra.gmra.mxu1 %vm56_vm0, %v190_v56 }
 0x15a   :  { %276 = vmatprep.mubr.f32.mxu1 %v873_v30 }
 0x15d   :  { %756 = vmatmul.mubr.msk.f32.gmra.mxu1 %vm56_vm0, %v191_v57 }
 0x15e   :  { %282 = vmatprep.mubr.f32.mxu1 %v873_v30 }
 0x161   :  { %757 = vmatmul.mubr.msk.f32.gmra.mxu1 %vm56_vm0, %v192_v58 }
 0x162   :  { %288 = vmatprep.mubr.f32.mxu1 %v873_v30 }
 0x165   :  { %758 = vmatmul.mubr.msk.f32.gmra.mxu1 %vm56_vm0, %v193_v59 }
 0x166   :  { %695 = vmatprep.mubr.f32.mxu1 %v873_v30 }
 0x19b   :  { %v816_v60 = vpop.f32.mrf.mxu0 }
 0x19c   :  { %v387_v61 = vadd.f32 1e-08, %v816_v60 }
 0x19d   :  { %v381_v62 = vpop.f32.mrf.mxu0 }
 0x19e   :  { %842 = vrsqrt.f32 %v387_v61  ;;  %v382_v63 = vadd.f32 1e-08, %v381_v62 }
 0x19f   :  { %v819_v0 = vpop.f32.mrf.mxu0 }
 0x1a0   :  { %v397_v1 = vadd.f32 1e-08, %v819_v0  ;;  %844 = vrsqrt.f32 %v382_v63 }
 0x1a1   :  { %v391_v2 = vpop.f32.mrf.mxu0 }
 0x1a2   :  { %846 = vrsqrt.f32 %v397_v1  ;;  %v392_v3 = vadd.f32 1e-08, %v391_v2 }
 0x1a3   :  { %v830_v5 = vpop.f32.mrf.mxu0 }
 0x1a4   :  { %848 = vrsqrt.f32 %v392_v3  ;;  %v580_v18 = vadd.f32 %v830_v5, %v493_v15 }
 0x1a5   :  { %v574_v8 = vpop.f32.mrf.mxu0 }
 0x1a6   :  { %v575_v22 = vadd.f32 %v574_v8, %v492_v20  ;;  %v707_v20 = vld [vmem:[%s1132_s11] sm:$0x77]  ;;  %s874_s11 = smov [#allocation2]  }
 0x1a7   :  { %v833_v12 = vpop.f32.mrf.mxu0  ;;  %s741_s5 = sshll.u32 %s874_s11, 4  ;;  %s742_s5 = int_to_ptr.vmem [resolvable:$true] %s741_s5 }
 0x1a8   :  { %v590_v13 = vadd.f32 %v833_v12, %v495_v9  ;;  %s854_s26 = scalar_lea.vmem %s742_s5, 32  ;;  %p855_p1 = scmp.lt.s32.totalorder %s742_s5, %s742_s5 }
 0x1a9   :  { %v584_v16 = vpop.f32.mrf.mxu0 }
 0x1aa   :  { %v585_v19 = vadd.f32 %v584_v16, %v494_v17 }
 0x1ab   :  { %v843_v4 = vpop.eup %842 }
 0x1ac   :  { %411 = vperm.xlu1 %840, %v843_v4  }
 0x1ad   :  { %v845_v6 = vpop.eup %844 }
 0x1af   :  { %v847_v7 = vpop.eup %846 }
 0x1b0   :  { %421 = vperm.xlu0 %839, %v847_v7   ;;  %406 = vperm.xlu1 %840, %v845_v6  }
 0x1b1   :  { %v849_v11 = vpop.eup %848 }
 0x1b4   :  { %443 = vperm.xlu0 %839, %v433_v10   ;;  %416 = vperm.xlu1 %840, %v849_v11  }
 0x1b8   :  { %438 = vperm.xlu0 %839, %v432_v14   ;;  %611 = vperm.xlu1 %840, %v590_v13  }
 0x1bc   :  { %601 = vperm.xlu0 %839, %v580_v18   ;;  %606 = vperm.xlu1 %840, %v585_v19   ;;  %v593_v19 = vld [vmem:[%s1130_s9] sm:$0x7] }
 0x1c0   :  { %625 = vperm.xlu0 %839, %v622_v21   ;;  %596 = vperm.xlu1 %840, %v575_v22  }
 0x219   :  { %v272_v23 = vpop.f32.mrf.mxu1 }
 0x21b   :  { %v274_v24 = vpop.f32.mrf.mxu1 }
 0x21d   :  { %v278_v25 = vpop.f32.mrf.mxu1 }
 0x21f   :  { %v280_v26 = vpop.f32.mrf.mxu1 }
 0x221   :  { %v284_v28 = vpop.f32.mrf.mxu1 }
 0x223   :  { %v286_v29 = vpop.f32.mrf.mxu1 }
 0x225   :  { %v290_v30 = vpop.f32.mrf.mxu1 }
 0x227   :  { %v412_v32 = vpop.permute.xlu1 %411  ;;  %v292_v33 = vpop.f32.mrf.mxu1 }
 0x228   :  { %v426_v40 = vmul.f32 %v412_v32, %v278_v25  ;;  %v427_v43 = vmul.f32 %v412_v32, %v280_v26 }
 0x22b   :  { %v422_v34 = vpop.permute.xlu0 %421  ;;  %v407_v35 = vpop.permute.xlu1 %406 }
 0x22c   :  { %v430_v36 = vmul.f32 %v422_v34, %v290_v30  ;;  %v431_v37 = vmul.f32 %v422_v34, %v292_v33  ;;  %v424_v44 = vmul.f32 %v407_v35, %v272_v23  ;;  %v425_v49 = vmul.f32 %v407_v35, %v274_v24 }
 0x22d   :  { %v709_v24 = vcombine.high %v707_v20, %v707_v20 }
 0x22e   :  { %v462_v38 = vadd.f32 %v454_v27, %v430_v36  ;;  %v463_v39 = vadd.f32 %v454_v27, %v431_v37 }
 0x22f   :  { %v444_v41 = vpop.permute.xlu0 %443  ;;  %v417_v42 = vpop.permute.xlu1 %416 }
 0x230   :  { %v428_v45 = vmul.f32 %v417_v42, %v284_v28  ;;  %v429_v46 = vmul.f32 %v417_v42, %v286_v29  ;;  %vm470_vm1 = vcmp.gt.f32.partialorder %v462_v38, 0.0  ;;  %vm471_vm2 = vcmp.gt.f32.partialorder %v463_v39, 0.0 }
 0x231   :  { %v478_v47 = vmul.f32 0.2, %v462_v38  ;;  %v479_v48 = vmul.f32 0.2, %v463_v39  ;;  %v458_v50 = vadd.f32 %v444_v41, %v426_v40  ;;  %v459_v53 = vadd.f32 %v444_v41, %v427_v43 }
 0x232   :  { %v460_v51 = vadd.f32 %v449_v31, %v428_v45  ;;  %v461_v52 = vadd.f32 %v449_v31, %v429_v46 }
 0x233   :  { %v439_v54 = vpop.permute.xlu0 %438  ;;  %v486_v55 = vsel %vm470_vm1, %v462_v38, %v478_v47  ;;  %v487_v56 = vsel %vm471_vm2, %v463_v39, %v479_v48  ;;  %v612_v57 = vpop.permute.xlu1 %611  ;;  %v474_v62 = vmul.f32 0.2, %v458_v50  ;;  %v475_v0 = vmul.f32 0.2, %v459_v53 }
 0x234   :  { %v456_v58 = vadd.f32 %v439_v54, %v424_v44  ;;  %v457_v59 = vadd.f32 %v439_v54, %v425_v49  ;;  %v620_v60 = vmul.f32 %v612_v57, %v486_v55  ;;  %v621_v61 = vmul.f32 %v612_v57, %v487_v56 }
 0x235   :  { %vm468_vm3 = vcmp.gt.f32.partialorder %v460_v51, 0.0  ;;  %vm469_vm4 = vcmp.gt.f32.partialorder %v461_v52, 0.0  ;;  %v476_v63 = vmul.f32 0.2, %v460_v51  ;;  %v477_v2 = vmul.f32 0.2, %v461_v52 }
 0x236   :  { %655 = vmatprep.subr.mxu1 %v621_v61  ;;  %v473_v1 = vmul.f32 0.2, %v457_v59  ;;  %v472_v4 = vmul.f32 0.2, %v456_v58  ;;  %vm467_vm5 = vcmp.gt.f32.partialorder %v459_v53, 0.0  ;;  %vm465_vm6 = vcmp.gt.f32.partialorder %v457_v59, 0.0 }
 0x237   :  { %656 = vmatpush1.msra.mxu1 %v620_v60  ;;  %v607_v3 = vpop.permute.xlu1 %606  ;;  %v484_v5 = vsel %vm468_vm3, %v460_v51, %v476_v63  ;;  %vm466_vm7 = vcmp.gt.f32.partialorder %v458_v50, 0.0  ;;  %v602_v6 = vpop.permute.xlu0 %601  ;;  %v485_v7 = vsel %vm469_vm4, %v461_v52, %v477_v2  ;;  %vm464_vm8 = vcmp.gt.f32.partialorder %v456_v58, 0.0 }
 0x238   :  { %v618_v8 = vmul.f32 %v607_v3, %v484_v5  ;;  %v619_v9 = vmul.f32 %v607_v3, %v485_v7  ;;  %v483_v10 = vsel %vm467_vm5, %v459_v53, %v475_v0  ;;  %v481_v11 = vsel %vm465_vm6, %v457_v59, %v473_v1 }
 0x239   :  { %v482_v13 = vsel %vm466_vm7, %v458_v50, %v474_v62  ;;  %v617_v14 = vmul.f32 %v602_v6, %v483_v10  ;;  %v480_v15 = vsel %vm464_vm8, %v456_v58, %v472_v4 }
 0x23a   :  { %657 = vmatprep.subr.mxu1 %v619_v9  ;;  %v616_v17 = vmul.f32 %v602_v6, %v482_v13 }
 0x23b   :  { %v597_v12 = vpop.permute.xlu1 %596  ;;  %658 = vmatpush1.msra.mxu1 %v618_v8  ;;  %v626_v21 = vpop.permute.xlu0 %625 }
 0x23c   :  { %v615_v16 = vmul.f32 %v597_v12, %v481_v11  ;;  %v614_v18 = vmul.f32 %v597_v12, %v480_v15  ;;  %659 = vmatprep.subr.mxu1 %v617_v14 }
 0x23d   :  { %660 = vmatpush1.msra.mxu1 %v616_v17 }
 0x23e   :  { %661 = vmatprep.subr.mxu1 %v615_v16 }
 0x23f   :  { %662 = vmatpush1.msra.mxu1 %v614_v18 }
 0x240   :  { %767 = vmatmul.mubr.msk.f32.vlgmr.msra.gmra.mxu1 %vm56_vm0, %v593_v19 }
 0x300   :  { %v697_v22 = vpop.f32.mrf.mxu1 }
 0x301   :  { %v698_v23 = vadd.f32 %v697_v22, %v626_v21 }
 0x302   :  { %v699_v25 = vpop.f32.mrf.mxu1 }
 0x303   :  { %v711_v26 = vsub.f32 %v698_v23, %v707_v20  ;;  %v700_v27 = vadd.f32 %v699_v25, %v626_v21 }
 0x305   :  { %v713_v28 = vmul.f32 %v711_v26, %v711_v26  ;;  %v704_v29 = vcombine.low %v698_v23, %v700_v27  ;;  %v712_v30 = vsub.f32 %v700_v27, %v709_v24 }
 0x307   :  { %706 = vst [vmem:[%s1133_s12] sm:$0x77] %v704_v29  ;;  %v714_v31 = vmul.f32 %v712_v30, %v712_v30  ;;  %v716_v32 = vsel %vm715_vm9, %v713_v28, 0.0  ;;  %s850_s12 = scalar_lea.vmem %s742_s5, 16 }
 0x308   :  { %p851_p0 = scmp.ne.s32.totalorder %s742_s5, %s850_s12  ;;  %p856_p2 = scmp.lt.s32.totalorder %s854_s26, %s850_s12 }
 0x309   :  { %v717_v33 = vsel %vm715_vm9, %v714_v31, 0.0 }
 0x30a   :  { %v718_v34 = vadd.f32 %v717_v33, %v716_v32  ;;  %p857_p3 = por %p856_p2, %p855_p1 }
 0x30c   :  { %719 = vadd.xlane.f32.xlu1 %v718_v34  ;;  %p858_p4 = pnand %p857_p3, %p851_p0 }
 0x395   :  { %v720_v35 = vpop.xlane.xlu1 %719 }
 0x396   :  { %v721_v36 = vrot.slane %v720_v35, 4 }
 0x398   :  { %v722_v37 = vadd.f32 %v721_v36, %v720_v35 }
 0x39a   :  { %v723_v38 = vrot.slane %v722_v37, 2 }
 0x39c   :  { %v724_v39 = vadd.f32 %v723_v38, %v722_v37 }
 0x39e   :  { %v725_v40 = vrot.slane %v724_v39, 1 }
 0x3a0   :  { %v726_v41 = vadd.f32 %v725_v40, %v724_v39 }
 0x3a2   :  { %834 = vpush %v726_v41 }
 0x3d3   :  { %s835_s25 = spop %834 }
 0x3d4   :  { %v728_v42 = vstv %s835_s25 }
 0x3d5   :  { %v730_v43 = vmul.f32 0.0013020834, %v728_v42 }
 0x3d7   :  { %732 = vst.msk [vmem:[#allocation2] sm:$0x1] %vm731_vm10, %v730_v43 }
 0x3d8   :  { %861 = shalt.err (!%p858_p4)
}
 0x3d9   :  { %744 = dma.vmem_to_hbm [thread:$0]  %s742_s5, 16, %s1134_s13, [#allocation3]  }
 0x3da   :  { %870 = dma.done.wait [#allocation3], 16  }
 0x3db   :  { %871 = vsyncadd [#allocation3], 4294967280 }
 0x3dc   :  { %750 = vsyncpa [#allocation3], 1 }

</bundles_post_ra>
